<compile_context>
chip_gen: v6e
topology: v6e:2x2x1
jax: 0.10.0
libtpu: 0.0.40
codegen_flags: <defaults>
</compile_context>

<pallas_src>
import jax
import jax.numpy as jnp
import numpy as np
from jax.experimental import pallas as pl
from jax.experimental.pallas import tpu as pltpu


# ------------------------------- kernel ------------------------------------ #

def _res_block_kernel(x_ref, r1_ref, r2_ref, b1_ref, b2_ref, o_ref):
    # x_ref: (H, L) f32    r*_ref: (3L, L) bf16    b*_ref: (1, L) f32
    x = x_ref[...].astype(jnp.float32)
    H, L = x.shape

    row = jax.lax.broadcasted_iota(jnp.int32, (H, L), 0)
    not_top = row != 0        # rows where the h-1 neighbour exists
    not_bot = row != (H - 1)  # rows where the h+1 neighbour exists

    def conv3x3(z, r_ref, b_ref):
        # Row (kh) shifts on the XLU (free VLIW slot); the mask implements the
        # zero padding along H by killing the wrapped row.
        up = jnp.where(not_top, pltpu.roll(z, shift=1, axis=0), 0.0)      # z[h-1]
        dn = jnp.where(not_bot, pltpu.roll(z, shift=H - 1, axis=0), 0.0)  # z[h+1]
        zcat = jnp.concatenate(
            [up.astype(jnp.bfloat16), z.astype(jnp.bfloat16),
             dn.astype(jnp.bfloat16)], axis=-1)                           # (H, 3L)
        # Single deep-K bf16 MXU matmul per conv, f32 accumulation.
        acc = jnp.dot(zcat, r_ref[...], preferred_element_type=jnp.float32)
        return acc + b_ref[...]                                           # bias bcast

    h1 = jnp.maximum(conv3x3(x, r1_ref, b1_ref), 0.0)   # conv1 + ReLU (f32 VPU)
    y2 = conv3x3(h1, r2_ref, b2_ref)                    # conv2
    o_ref[...] = (x + y2).astype(o_ref.dtype)           # residual add (f32)


# --------------------------- host-side helpers ------------------------------ #

def _pick_samples_per_block(N, cw):
    """Smallest sample grouping giving a 128-aligned lane block (least kron
    zero-FLOP waste, most parallel grid steps), optionally widened to a
    256-multiple for the 256-wide v6e/v7x MXUs when cheap."""
    c128 = [c for c in range(1, N + 1) if N % c == 0 and (c * cw) % 128 == 0]
    if not c128:
        # TODO(synk): pad the lane axis with dummy samples instead of failing.
        raise ValueError(
            f"No sample grouping makes the lane width a multiple of 128 "
            f"(N={N}, C*W={cw}); pad the lane axis before calling this kernel.")
    spb = c128[0]
    if (spb * cw) % 256 != 0:
        c256 = [c for c in c128 if (c * cw) % 256 == 0]
        if c256 and c256[0] <= 2 * spb and (N // c256[0]) >= 2:
            spb = c256[0]
    return spb


def _mix_mats_stacked(w, spb, W_sp):
    """Stacked conv matrix R = [R_0; R_1; R_2], shape (3L, L), L = spb*C*W.

    R_kh[(n,c,w_in), (n,o,x)] = w[o, c, kh, w_in - x + 1] for |w_in - x| <= 1,
    block-diagonal over the spb samples sharing a lane block.  Returned in
    bf16 (MXU operand)."""
    w = np.asarray(w, dtype=np.float32)
    C = w.shape[0]
    cw = C * W_sp
    eye = np.eye(spb, dtype=np.float32)
    blocks = []
    for kh in range(3):
        R = np.zeros((C, W_sp, C, W_sp), np.float32)   # [c_in, w_in, c_out, x]
        for kw in range(3):
            d = kw - 1
            for x in range(W_sp):
                w_in = x + d
                if 0 <= w_in < W_sp:
                    R[:, w_in, :, x] += w[:, :, kh, kw].T   # [c_in, c_out]
        blocks.append(np.kron(eye, R.reshape(cw, cw)))      # (L, L)
    stacked = np.concatenate(blocks, axis=0)                # (3L, L)
    return jnp.asarray(stacked, dtype=jnp.bfloat16)


def _bias_row(b, spb, W_sp):
    b = np.asarray(b, dtype=np.float32)
    C = b.shape[0]
    row = np.broadcast_to(b[:, None], (C, W_sp)).reshape(-1)
    row = np.tile(row, spb)
    return jnp.asarray(row[None, :])   # (1, L) f32


# ------------------------------ pallas_call --------------------------------- #

def residual_block_slab(x2d, r1, r2, b1r, b2r):
    """Fused residual block on the slab layout X[h, n*C*W + c*W + w].

    Stacked ResidualBlocks should chain this directly and only convert layout
    at the ends (saves two HBM relayout passes per block)."""
    H, ncw = x2d.shape
    L = r1.shape[1]
    assert ncw % L == 0, (ncw, L)
    nblocks = ncw // L

    def const_spec(shape):
        idx = lambda i: (0,) * len(shape)
        if nblocks > 1:
            # Revisited every grid step -> single-buffer (halves their VMEM).
            return pl.BlockSpec(shape, idx, pipeline_mode=pl.Buffered(1))
        return pl.BlockSpec(shape, idx)

    flops = nblocks * 2 * (2 * H * (3 * L) * L)        # 2 convs, Z @ R each
    bytes_accessed = (2 * H * ncw * 4                  # x in + out (f32)
                      + 2 * 3 * L * L * 2              # r1 + r2 (bf16)
                      + 2 * L * 4)                     # bias rows

    # Rough per-step VMEM footprint; raise the scoped limit only when needed.
    vmem_est = (4 * H * L * 4          # x + out blocks, double-buffered
                + 2 * 3 * L * L * 2    # r1 + r2 (bf16)
                + 2 * 2 * L * 4        # bias rows
                + 4 * H * 3 * L * 4)   # zcat / intermediates headroom
    cp = dict(dimension_semantics=("parallel",))
    if vmem_est > 16 * 1024 * 1024:
        cp["vmem_limit_bytes"] = min(2 * vmem_est, 100 * 1024 * 1024)

    return pl.pallas_call(
        _res_block_kernel,
        out_shape=jax.ShapeDtypeStruct((H, ncw), x2d.dtype),
        grid_spec=pltpu.PrefetchScalarGridSpec(
            num_scalar_prefetch=0,
            grid=(nblocks,),
            in_specs=[
                pl.BlockSpec((H, L), lambda i: (0, i)),   # x lane-block
                const_spec((3 * L, L)),                   # conv1 stacked weights
                const_spec((3 * L, L)),                   # conv2 stacked weights
                const_spec((1, L)),                       # bias1 row
                const_spec((1, L)),                       # bias2 row
            ],
            out_specs=pl.BlockSpec((H, L), lambda i: (0, i)),
        ),
        compiler_params=pltpu.CompilerParams(**cp),
        cost_estimate=pl.CostEstimate(
            flops=flops, transcendentals=0, bytes_accessed=bytes_accessed),
    )(x2d, r1, r2, b1r, b2r)


def residual_block(x, w1, b1, w2, b2):
    """x: (N, C, H, W) f32; w*: (C, C, 3, 3); b*: (C,). Returns (N, C, H, W)."""
    N, C, H, W = x.shape
    cw = C * W
    spb = _pick_samples_per_block(N, cw)

    r1 = _mix_mats_stacked(w1, spb, W)   # (3L, L) bf16
    r2 = _mix_mats_stacked(w2, spb, W)   # (3L, L) bf16
    b1r = _bias_row(b1, spb, W)          # (1, L) f32
    b2r = _bias_row(b2, spb, W)          # (1, L) f32

    # Layout plumbing; hoist around a stack of residual blocks in real use.
    x2d = jnp.transpose(x, (2, 0, 1, 3)).reshape(H, N * cw)
    out2d = residual_block_slab(x2d, r1, r2, b1r, b2r)
    return out2d.reshape(H, N, C, W).transpose(1, 2, 0, 3)


# ------------------------------- reference ---------------------------------- #

def _reference(x, w1, b1, w2, b2):
    """Pure-JAX reference mirroring the PyTorch module."""
    dn = jax.lax.conv_dimension_numbers(x.shape, w1.shape, ("NCHW", "OIHW", "NCHW"))

    def conv(z, w, b):
        y = jax.lax.conv_general_dilated(
            z, w, window_strides=(1, 1), padding=((1, 1), (1, 1)),
            dimension_numbers=dn)
        return y + b[None, :, None, None]

    h = jnp.maximum(conv(x, w1, b1), 0.0)
    return x + conv(h, w2, b2)


if __name__ == "__main__":
    N, C, H, W = 2, 4, 16, 16

    key = jax.random.PRNGKey(0)
    k1, k2, k3, k4, k5 = jax.random.split(key, 5)
    scale = 1.0 / np.sqrt(C * 9)  # PyTorch-style Conv2d init scale
    x = jax.random.normal(k1, (N, C, H, W), dtype=jnp.float32)
    w1 = jax.random.uniform(k2, (C, C, 3, 3), jnp.float32, -scale, scale)
    b1 = jax.random.uniform(k3, (C,), jnp.float32, -scale, scale)
    w2 = jax.random.uniform(k4, (C, C, 3, 3), jnp.float32, -scale, scale)
    b2 = jax.random.uniform(k5, (C,), jnp.float32, -scale, scale)

    out = residual_block(x, w1, b1, w2, b2)
    out = jax.block_until_ready(out)

    ref = _reference(x, w1, b1, w2, b2)
    # bf16 MXU operands with f32 accumulation: observed error ~1e-3 here.
    np.testing.assert_allclose(np.asarray(out), np.asarray(ref), rtol=1e-2, atol=1e-2)

    print("KERNEL_OK")
</pallas_src>

<mosaic_0001>
module attributes {stable_mosaic.version = 11 : i64} {
  func.func @_res_block_kernel(%arg0: i32, %arg1: memref<16x128xf32, #tpu.memory_space<vmem>>, %arg2: memref<384x128xbf16, #tpu.memory_space<vmem>>, %arg3: memref<384x128xbf16, #tpu.memory_space<vmem>>, %arg4: memref<1x128xf32, #tpu.memory_space<vmem>>, %arg5: memref<1x128xf32, #tpu.memory_space<vmem>>, %arg6: memref<16x128xf32, #tpu.memory_space<vmem>>) attributes {dimension_semantics = [#tpu.dimension_semantics<parallel>], iteration_bounds = array<i64: 1>, scalar_prefetch = 0 : i64, scratch_operands = 0 : i64, tpu.core_type = #tpu.core_type<tc>, window_params = [{transform_indices = @transform_0, window_bounds = array<i64: 16, 128>}, {pipeline_mode = #tpu.pipeline_mode<synchronous>, transform_indices = @transform_1, window_bounds = array<i64: 384, 128>}, {pipeline_mode = #tpu.pipeline_mode<synchronous>, transform_indices = @transform_2, window_bounds = array<i64: 384, 128>}, {pipeline_mode = #tpu.pipeline_mode<synchronous>, transform_indices = @transform_3, window_bounds = array<i64: 1, 128>}, {pipeline_mode = #tpu.pipeline_mode<synchronous>, transform_indices = @transform_4, window_bounds = array<i64: 1, 128>}, {transform_indices = @transform_5, window_bounds = array<i64: 16, 128>}]} {
    %c0 = arith.constant 0 : index
    %c0_0 = arith.constant 0 : index
    %0 = vector.load %arg1[%c0, %c0_0] : memref<16x128xf32, #tpu.memory_space<vmem>>, vector<16x128xf32>
    %1 = tpu.iota {dimensions = array<i32: 0>} : vector<16x128xi32>
    %c0_i32 = arith.constant 0 : i32
    %2 = vector.broadcast %c0_i32 : i32 to vector<16x128xi32>
    %3 = arith.cmpi ne, %1, %2 : vector<16x128xi32>
    %c15_i32 = arith.constant 15 : i32
    %4 = vector.broadcast %c15_i32 : i32 to vector<16x128xi32>
    %5 = arith.cmpi ne, %1, %4 : vector<16x128xi32>
    %c1_i32 = arith.constant 1 : i32
    %6 = tpu.dynamic_rotate %0 by %c1_i32 dim 0 : vector<16x128xf32>, i32 -> vector<16x128xf32>
    %cst = arith.constant 0.000000e+00 : f32
    %7 = vector.broadcast %cst : f32 to vector<16x128xf32>
    %8 = arith.select %3, %6, %7 : vector<16x128xi1>, vector<16x128xf32>
    %c15_i32_1 = arith.constant 15 : i32
    %9 = tpu.dynamic_rotate %0 by %c15_i32_1 dim 0 : vector<16x128xf32>, i32 -> vector<16x128xf32>
    %cst_2 = arith.constant 0.000000e+00 : f32
    %10 = vector.broadcast %cst_2 : f32 to vector<16x128xf32>
    %11 = arith.select %5, %9, %10 : vector<16x128xi1>, vector<16x128xf32>
    %12 = arith.truncf %8 : vector<16x128xf32> to vector<16x128xbf16>
    %13 = arith.truncf %0 : vector<16x128xf32> to vector<16x128xbf16>
    %14 = arith.truncf %11 : vector<16x128xf32> to vector<16x128xbf16>
    %15 = tpu.concatenate %12, %13, %14 in 1 : vector<16x128xbf16>, vector<16x128xbf16>, vector<16x128xbf16> -> vector<16x384xbf16>
    %c0_3 = arith.constant 0 : index
    %c0_4 = arith.constant 0 : index
    %16 = vector.load %arg2[%c0_3, %c0_4] : memref<384x128xbf16, #tpu.memory_space<vmem>>, vector<384x128xbf16>
    %cst_5 = arith.constant dense<0.000000e+00> : vector<16x128xf32>
    %17 = tpu.matmul %15, %16, %cst_5 {dimension_numbers = #tpu.dot_dimension_numbers<[1], [0], [0], [1], [0, 0, 1, 1], [], []>} : vector<16x384xbf16>, vector<384x128xbf16>, vector<16x128xf32> -> vector<16x128xf32>
    %c0_6 = arith.constant 0 : index
    %c0_7 = arith.constant 0 : index
    %18 = vector.load %arg4[%c0_6, %c0_7] : memref<1x128xf32, #tpu.memory_space<vmem>>, vector<1x128xf32>
    %19 = vector.broadcast %18 : vector<1x128xf32> to vector<16x128xf32>
    %20 = arith.addf %17, %19 : vector<16x128xf32>
    %cst_8 = arith.constant 0.000000e+00 : f32
    %21 = vector.broadcast %cst_8 : f32 to vector<16x128xf32>
    %22 = arith.maximumf %20, %21 : vector<16x128xf32>
    %c1_i32_9 = arith.constant 1 : i32
    %23 = tpu.dynamic_rotate %22 by %c1_i32_9 dim 0 : vector<16x128xf32>, i32 -> vector<16x128xf32>
    %cst_10 = arith.constant 0.000000e+00 : f32
    %24 = vector.broadcast %cst_10 : f32 to vector<16x128xf32>
    %25 = arith.select %3, %23, %24 : vector<16x128xi1>, vector<16x128xf32>
    %c15_i32_11 = arith.constant 15 : i32
    %26 = tpu.dynamic_rotate %22 by %c15_i32_11 dim 0 : vector<16x128xf32>, i32 -> vector<16x128xf32>
    %cst_12 = arith.constant 0.000000e+00 : f32
    %27 = vector.broadcast %cst_12 : f32 to vector<16x128xf32>
    %28 = arith.select %5, %26, %27 : vector<16x128xi1>, vector<16x128xf32>
    %29 = arith.truncf %25 : vector<16x128xf32> to vector<16x128xbf16>
    %30 = arith.truncf %22 : vector<16x128xf32> to vector<16x128xbf16>
    %31 = arith.truncf %28 : vector<16x128xf32> to vector<16x128xbf16>
    %32 = tpu.concatenate %29, %30, %31 in 1 : vector<16x128xbf16>, vector<16x128xbf16>, vector<16x128xbf16> -> vector<16x384xbf16>
    %c0_13 = arith.constant 0 : index
    %c0_14 = arith.constant 0 : index
    %33 = vector.load %arg3[%c0_13, %c0_14] : memref<384x128xbf16, #tpu.memory_space<vmem>>, vector<384x128xbf16>
    %cst_15 = arith.constant dense<0.000000e+00> : vector<16x128xf32>
    %34 = tpu.matmul %32, %33, %cst_15 {dimension_numbers = #tpu.dot_dimension_numbers<[1], [0], [0], [1], [0, 0, 1, 1], [], []>} : vector<16x384xbf16>, vector<384x128xbf16>, vector<16x128xf32> -> vector<16x128xf32>
    %c0_16 = arith.constant 0 : index
    %c0_17 = arith.constant 0 : index
    %35 = vector.load %arg5[%c0_16, %c0_17] : memref<1x128xf32, #tpu.memory_space<vmem>>, vector<1x128xf32>
    %36 = vector.broadcast %35 : vector<1x128xf32> to vector<16x128xf32>
    %37 = arith.addf %34, %36 : vector<16x128xf32>
    %38 = arith.addf %0, %37 : vector<16x128xf32>
    %c0_18 = arith.constant 0 : index
    %c0_19 = arith.constant 0 : index
    %39 = vector.load %arg6[%c0_18, %c0_19] : memref<16x128xf32, #tpu.memory_space<vmem>>, vector<16x128xf32>
    tpu.vector_store %arg6[%c0_18, %c0_19], %38 {strides = array<i32>} : memref<16x128xf32, #tpu.memory_space<vmem>>, vector<16x128xf32>,
    return
  }
  func.func @transform_0(%arg0: i32) -> (i32, i32) {
    %c0_i32 = arith.constant 0 : i32
    %c0_i32_0 = arith.constant 0 : i32
    return %c0_i32, %arg0 : i32, i32
  }
  func.func @transform_1(%arg0: i32) -> (i32, i32) {
    %c0_i32 = arith.constant 0 : i32
    %c0_i32_0 = arith.constant 0 : i32
    %c0_i32_1 = arith.constant 0 : i32
    return %c0_i32, %c0_i32_0 : i32, i32
  }
  func.func @transform_2(%arg0: i32) -> (i32, i32) {
    %c0_i32 = arith.constant 0 : i32
    %c0_i32_0 = arith.constant 0 : i32
    %c0_i32_1 = arith.constant 0 : i32
    return %c0_i32, %c0_i32_0 : i32, i32
  }
  func.func @transform_3(%arg0: i32) -> (i32, i32) {
    %c0_i32 = arith.constant 0 : i32
    %c0_i32_0 = arith.constant 0 : i32
    %c0_i32_1 = arith.constant 0 : i32
    return %c0_i32, %c0_i32_0 : i32, i32
  }
  func.func @transform_4(%arg0: i32) -> (i32, i32) {
    %c0_i32 = arith.constant 0 : i32
    %c0_i32_0 = arith.constant 0 : i32
    %c0_i32_1 = arith.constant 0 : i32
    return %c0_i32, %c0_i32_0 : i32, i32
  }
  func.func @transform_5(%arg0: i32) -> (i32, i32) {
    %c0_i32 = arith.constant 0 : i32
    %c0_i32_0 = arith.constant 0 : i32
    return %c0_i32, %arg0 : i32, i32
  }
}

</mosaic_0001>

<bundles_post_ra>
// kernel: tpu_custom_call.1
= control target key start
LH: loop header
LB: loop body
LE: loop exit
PB: predicated region body
PF: predicated region fallthrough
CT: control target
= control target key end

     0   :  { %10 = vsyncpa [#allocation3], 0  ;;  %s1138_s0 = inlined_call_operand.hbm [shape: f32[16,128], index: 0, kind: input, shape index: {}]   ;;  %s1139_s1 = inlined_call_operand.hbm [shape: bf16[384,128], index: 1, kind: input, shape index: {}]   ;;  %s1140_s2 = inlined_call_operand.hbm [shape: bf16[384,128], index: 2, kind: input, shape index: {}]   ;;  %s1141_s3 = inlined_call_operand.vmem [shape: f32[1,128], index: 3, kind: input, shape index: {}]   ;;  %s1142_s4 = inlined_call_operand.vmem [shape: f32[1,128], index: 4, kind: input, shape index: {}]   ;;  %s1143_s5 = inlined_call_operand.hbm [shape: f32[16,128], index: 5, kind: output, shape index: {}]  }
   0x1   :  { %11 = vsyncpa [#allocation6], 0 }
   0x2   :  { %12 = vsyncpa [#allocation4], 0  ;;  %s999_s18 = smov [#allocation5]  }
   0x3   :  { %s30_s19 = sshll.u32 %s999_s18, 4  ;;  %s31_s19 = int_to_ptr.vmem [resolvable:$true] %s30_s19 }
   0x4   :  { %s921_s20 = scalar_lea.vmem %s31_s19, 3072  ;;  %p926_p1 = scmp.lt.s32.totalorder %s31_s19, %s31_s19 }
   0x5   :  { %p922_p0 = scmp.ne.s32.totalorder %s31_s19, %s921_s20  ;;  %p927_p2 = scmp.lt.s32.totalorder %s921_s20, %s921_s20 }
   0x7   :  { %p928_p3 = por %p927_p2, %p926_p1 }
   0x9   :  { %p929_p4 = pnand %p928_p3, %p922_p0 }
   0xb   :  { %932 = shalt.err (!%p929_p4)
}
   0xc   :  { %s1000_s21 = smov 64   ;;  %s1001_s22 = smov 4  }
   0xd   :  { %36 = dma.hbm_to_vmem [thread:$0]  %s1139_s1, 3072, %s31_s19, [#allocation6], %s1000_s21, %s1000_s21, %s1001_s22  }
   0xe   :  { %s1002_s25 = smov [#allocation2]  }
   0xf   :  { %s18_s26 = sshll.u32 %s1002_s25, 4  ;;  %s19_s26 = int_to_ptr.vmem [resolvable:$true] %s18_s26 }
  0x10   :  { %s941_s27 = scalar_lea.vmem %s19_s26, 256  ;;  %p946_p6 = scmp.lt.s32.totalorder %s19_s26, %s19_s26 }
  0x11   :  { %p942_p5 = scmp.ne.s32.totalorder %s19_s26, %s941_s27  ;;  %p947_p7 = scmp.lt.s32.totalorder %s941_s27, %s941_s27 }
  0x13   :  { %p948_p8 = por %p947_p7, %p946_p6 }
  0x15   :  { %p949_p9 = pnand %p948_p8, %p942_p5 }
  0x17   :  { %952 = shalt.err (!%p949_p9)
}
  0x18   :  { %s1003_s28 = smov 128   ;;  %s1004_s29 = smov 8  }
  0x19   :  { %24 = dma.hbm_to_vmem [thread:$0]  %s1138_s0, 256, %s19_s26, [#allocation3], %s1003_s28, %s1003_s28, %s1004_s29  }
  0x1a   :  { %s1005_s1 = smov [#allocation7]  }
  0x1b   :  { %s42_s7 = sshll.u32 %s1005_s1, 4  ;;  %s43_s7 = int_to_ptr.vmem [resolvable:$true] %s42_s7 }
  0x1c   :  { %s961_s8 = scalar_lea.vmem %s43_s7, 3072  ;;  %p966_p11 = scmp.lt.s32.totalorder %s43_s7, %s43_s7 }
  0x1d   :  { %p962_p10 = scmp.ne.s32.totalorder %s43_s7, %s961_s8  ;;  %p967_p12 = scmp.lt.s32.totalorder %s961_s8, %s961_s8 }
  0x1f   :  { %p968_p13 = por %p967_p12, %p966_p11 }
  0x21   :  { %p969_p0 = pnand %p968_p13, %p962_p10 }
  0x23   :  { %972 = shalt.err (!%p969_p0)
}
  0x24   :  { %48 = dma.hbm_to_vmem [thread:$0]  %s1140_s2, 3072, %s43_s7, [#allocation6], %s1000_s21, %s1000_s21, %s1001_s22  }
  0x25   :  { %993 = dma.done.wait [#allocation3], 256  }
  0x26   :  { %994 = vsyncadd [#allocation3], 4294967040 }
  0x27   :  { %995 = dma.done.wait [#allocation6], 6144  }
  0x28   :  { %996 = vsyncadd [#allocation6], 4294961152  ;;  %v1006_v0 = vmov 0.0   ;;  %vm1007_vm0 = vmmov 0   ;;  %v865_v1 = vld [vmem:[#allocation5 + $0x78] sm:$0xff]   ;;  %v868_v4 = vld [vmem:[#allocation5 + $0x70] sm:$0xff]   ;;  %v65_v15 = vlaneseq }
  0x29   :  { %814 = vmatprep.subr.bf16.mxu1 %v1006_v0  ;;  %830 = vmatprep.mubr.msk.bf16.mxu1 %vm1007_vm0, %v1006_v0  ;;  %v866_v2 = vld [vmem:[#allocation5 + $0x38] sm:$0xff]   ;;  %v869_v5 = vld [vmem:[#allocation5 + $0x30] sm:$0xff]   ;;  %v871_v7 = vld [vmem:[#allocation5 + $0x68] sm:$0xff]   ;;  %vm1008_vm4 = vmmov 1   ;;  %s1009_s12 = smov [#allocation8]  }
  0x2a   :  { %752 = vmatprep.subr.bf16.mxu0 %v865_v1  ;;  %v867_v3 = vld [vmem:[#allocation5 + $0xb8] sm:$0xff]   ;;  %v870_v6 = vld [vmem:[#allocation5 + $0xb0] sm:$0xff]   ;;  %v872_v8 = vld [vmem:[#allocation5 + $0x28] sm:$0xff]   ;;  %v1059_v19 = vshrl.u32 %v65_v15, 7  ;;  %s677_s13 = sshll.u32 %s1009_s12, 4  ;;  %s678_s13 = int_to_ptr.vmem [resolvable:$true] %s677_s13 }
  0x2b   :  { %753 = vmatpush3.bf16.msra.mxu0 %v866_v2  ;;  %815 = vmatpush3.bf16.msra.mxu1 %v867_v3  ;;  %v873_v9 = vld [vmem:[#allocation5 + $0xa8] sm:$0xff]   ;;  %v874_v10 = vld [vmem:[#allocation5 + $0x60] sm:$0xff]   ;;  %v877_v13 = vld [vmem:[#allocation5 + $0x58] sm:$0xff]   ;;  %p978_p2 = scmp.lt.s32.totalorder %s678_s13, %s678_s13 }
  0x2c   :  { %754 = vmatprep.subr.bf16.mxu0 %v868_v4  ;;  %816 = vmatprep.subr.bf16.mxu1 %v1006_v0  ;;  %v875_v11 = vld [vmem:[#allocation5 + $0x20] sm:$0xff]   ;;  %v878_v14 = vld [vmem:[#allocation5 + $0x18] sm:$0xff]   ;;  %v880_v17 = vld [vmem:[#allocation5 + $0x50] sm:$0xff]   ;;  %vm68_vm1 = vcmp.ne.s32.totalorder %v1059_v19, 0  ;;  %v67_v23 = vadd.s32 8, %v1059_v19  ;;  %vm74_vm2 = vcmp.lt.s32.totalorder %v1059_v19, 1 }
  0x2d   :  { %v876_v12 = vld [vmem:[#allocation5 + $0xa0] sm:$0xff]   ;;  %v879_v16 = vld [vmem:[#allocation5 + $0x98] sm:$0xff]   ;;  %v881_v18 = vld [vmem:[#allocation5 + $0x10] sm:$0xff]   ;;  %vm81_vm3 = vcmp.lt.s32.totalorder %v1059_v19, 7 }
  0x2e   :  { %v882_v20 = vld [vmem:[#allocation5 + $0x90] sm:$0xff]   ;;  %v883_v21 = vld [vmem:[#allocation5 + $0x48] sm:$0xff]   ;;  %v886_v25 = vld [vmem:[#allocation5 + $0x40] sm:$0xff]   ;;  %vm71_vm6 = vcmp.ne.s32.totalorder %v67_v23, 15 }
  0x2f   :  { %755 = vmatpush3.bf16.msra.mxu0 %v869_v5  ;;  %817 = vmatpush3.bf16.msra.mxu1 %v870_v6  ;;  %v884_v22 = vld [vmem:[#allocation5 + $0x8] sm:$0xff]   ;;  %v1064_v26 = vld [vmem:[#allocation2] sm:$0xff]  ;;  %v1066_v27 = vld [vmem:[#allocation2 + $0x8] sm:$0xff] }
  0x30   :  { %756 = vmatprep.subr.bf16.mxu0 %v871_v7  ;;  %818 = vmatprep.subr.bf16.mxu1 %v1006_v0  ;;  %v885_v24 = vld [vmem:[#allocation5 + $0x88] sm:$0xff]   ;;  %v72_v28 = vrot.slane %v1064_v26, 7  ;;  %v73_v29 = vrot.slane %v1066_v27, 7  ;;  %v79_v30 = vrot.slane %v1064_v26, 1  ;;  %v80_v31 = vrot.slane %v1066_v27, 1  ;;  %vm1078_vm5 = vmpackc.low %vm1008_vm4, %vm68_vm1  ;;  %v887_v33 = vld [vmem:[#allocation5] sm:$0xff]  }
  0x31   :  { %v87_v34 = vpack.c.bf16 %v1066_v27, %v1064_v26  ;;  %v888_v35 = vld [vmem:[#allocation5 + $0x80] sm:$0xff]   ;;  %v889_v40 = vld [vmem:[#allocation7 + $0x78] sm:$0xff]   ;;  %vm1094_vm7 = vmpackc.low %vm71_vm6, %vm1008_vm4 }
  0x32   :  { %v75_v36 = vsel %vm74_vm2, %v72_v28, %v73_v29  ;;  %v76_v37 = vsel %vm74_vm2, %v73_v29, %v72_v28  ;;  %v82_v38 = vsel %vm81_vm3, %v79_v30, %v80_v31  ;;  %v83_v39 = vsel %vm81_vm3, %v80_v31, %v79_v30  ;;  %v890_v43 = vld [vmem:[#allocation7 + $0x38] sm:$0xff]   ;;  %v892_v46 = vld [vmem:[#allocation7 + $0x70] sm:$0xff]   ;;  %v895_v49 = vld [vmem:[#allocation7 + $0x68] sm:$0xff]  }
  0x33   :  { %757 = vmatpush3.bf16.msra.mxu0 %v872_v8  ;;  %819 = vmatpush3.bf16.msra.mxu1 %v873_v9  ;;  %v716_v42 = vpack.c.bf16 %v75_v36, %v76_v37  ;;  %v719_v44 = vpack.c.bf16 %v83_v39, %v82_v38  ;;  %v891_v45 = vld [vmem:[#allocation7 + $0xb8] sm:$0xff]   ;;  %v893_v47 = vld [vmem:[#allocation7 + $0x30] sm:$0xff]   ;;  %v896_v50 = vld [vmem:[#allocation7 + $0x28] sm:$0xff]  }
  0x34   :  { %758 = vmatprep.subr.bf16.mxu0 %v874_v10  ;;  %820 = vmatprep.subr.bf16.mxu1 %v1006_v0  ;;  %v894_v48 = vld [vmem:[#allocation7 + $0xb0] sm:$0xff]   ;;  %v897_v51 = vld [vmem:[#allocation7 + $0xa8] sm:$0xff]   ;;  %v898_v52 = vld [vmem:[#allocation7 + $0x60] sm:$0xff]  }
  0x35   :  { %320 = vmatprep.mubr.bf16.mxu0 %v87_v34  ;;  %v899_v53 = vld [vmem:[#allocation7 + $0x20] sm:$0xff]   ;;  %v901_v55 = vld [vmem:[#allocation7 + $0x58] sm:$0xff]   ;;  %v904_v58 = vld [vmem:[#allocation7 + $0x50] sm:$0xff]  }
  0x36   :  { %v900_v54 = vld [vmem:[#allocation7 + $0xa0] sm:$0xff]   ;;  %v902_v56 = vld [vmem:[#allocation7 + $0x18] sm:$0xff]   ;;  %v905_v59 = vld [vmem:[#allocation7 + $0x10] sm:$0xff]  }
  0x37   :  { %759 = vmatpush3.bf16.msra.mxu0 %v875_v11  ;;  %821 = vmatpush3.bf16.msra.mxu1 %v876_v12  ;;  %v903_v57 = vld [vmem:[#allocation7 + $0x98] sm:$0xff]   ;;  %v906_v60 = vld [vmem:[#allocation7 + $0x90] sm:$0xff]   ;;  %v907_v61 = vld [vmem:[#allocation7 + $0x48] sm:$0xff]  }
  0x38   :  { %760 = vmatprep.subr.bf16.mxu0 %v877_v13  ;;  %822 = vmatprep.subr.bf16.mxu1 %v1006_v0  ;;  %v908_v62 = vld [vmem:[#allocation7 + $0x8] sm:$0xff]   ;;  %v910_v1 = vld [vmem:[#allocation7 + $0x40] sm:$0xff]   ;;  %v690_v6 = vld [vmem:[%s1141_s3] ss:$0 sm:$0xff] }
  0x39   :  { %v909_v63 = vld [vmem:[#allocation7 + $0x88] sm:$0xff]   ;;  %v911_v2 = vld [vmem:[#allocation7] sm:$0xff]   ;;  %v721_v37 = vld [vmem:[%s1142_s4] ss:$0 sm:$0xff]  ;;  %s973_s4 = scalar_lea.vmem %s678_s13, 256 }
  0x3a   :  { %v912_v3 = vld [vmem:[#allocation7 + $0x80] sm:$0xff]   ;;  %p974_p1 = scmp.ne.s32.totalorder %s678_s13, %s973_s4  ;;  %p979_p3 = scmp.lt.s32.totalorder %s973_s4, %s973_s4 }
  0x3b   :  { %761 = vmatpush3.bf16.msra.mxu0 %v878_v14  ;;  %823 = vmatpush3.bf16.msra.mxu1 %v879_v16 }
  0x3c   :  { %762 = vmatprep.subr.bf16.mxu0 %v880_v17  ;;  %824 = vmatprep.subr.bf16.mxu1 %v1006_v0  ;;  %p980_p4 = por %p979_p3, %p978_p2 }
  0x3e   :  { %p981_p5 = pnand %p980_p4, %p974_p1 }
  0x3f   :  { %763 = vmatpush3.bf16.msra.mxu0 %v881_v18  ;;  %825 = vmatpush3.bf16.msra.mxu1 %v882_v20 }
  0x40   :  { %764 = vmatprep.subr.bf16.mxu0 %v883_v21  ;;  %826 = vmatprep.subr.bf16.mxu1 %v1006_v0 }
  0x43   :  { %765 = vmatpush3.bf16.msra.mxu0 %v884_v22  ;;  %827 = vmatpush3.bf16.msra.mxu1 %v885_v24 }
  0x44   :  { %766 = vmatprep.subr.bf16.mxu0 %v886_v25  ;;  %828 = vmatprep.subr.bf16.mxu1 %v1006_v0 }
  0x47   :  { %767 = vmatpush3.bf16.msra.mxu0 %v887_v33  ;;  %829 = vmatpush3.bf16.msra.mxu1 %v888_v35 }
  0x48   :  { %783 = vmatprep.subr.bf16.mxu0 %v889_v40  ;;  %834 = vmatprep.subr.bf16.mxu1 %v1006_v0 }
  0x4a   :  { %717 = vmatmul.mubr.msk.bf16.vlgmr.msra.gmra.mxu0 %vm1078_vm5, %v716_v42  ;;  %831 = vmatmul.mubr.msk.bf16.vlgmr.msra.gmra.mxu1 %vm1094_vm7, %v719_v44 }
  0x4b   :  { %784 = vmatpush3.bf16.msra.mxu0 %v890_v43  ;;  %835 = vmatpush3.bf16.msra.mxu1 %v891_v45 }
  0x4c   :  { %785 = vmatprep.subr.bf16.mxu0 %v892_v46  ;;  %836 = vmatprep.subr.bf16.mxu1 %v1006_v0 }
  0x4d   :  { %850 = vmatprep.mubr.msk.bf16.mxu1 %vm1007_vm0, %v1006_v0 }
  0x4f   :  { %786 = vmatpush3.bf16.msra.mxu0 %v893_v47  ;;  %837 = vmatpush3.bf16.msra.mxu1 %v894_v48 }
  0x50   :  { %787 = vmatprep.subr.bf16.mxu0 %v895_v49  ;;  %838 = vmatprep.subr.bf16.mxu1 %v1006_v0 }
  0x53   :  { %788 = vmatpush3.bf16.msra.mxu0 %v896_v50  ;;  %839 = vmatpush3.bf16.msra.mxu1 %v897_v51 }
  0x54   :  { %840 = vmatprep.subr.bf16.mxu1 %v1006_v0  ;;  %789 = vmatprep.subr.bf16.mxu0 %v898_v52 }
  0x57   :  { %790 = vmatpush3.bf16.msra.mxu0 %v899_v53  ;;  %841 = vmatpush3.bf16.msra.mxu1 %v900_v54 }
  0x58   :  { %842 = vmatprep.subr.bf16.mxu1 %v1006_v0  ;;  %791 = vmatprep.subr.bf16.mxu0 %v901_v55 }
  0x5b   :  { %792 = vmatpush3.bf16.msra.mxu0 %v902_v56  ;;  %843 = vmatpush3.bf16.msra.mxu1 %v903_v57 }
  0x5c   :  { %844 = vmatprep.subr.bf16.mxu1 %v1006_v0  ;;  %793 = vmatprep.subr.bf16.mxu0 %v904_v58 }
  0x5f   :  { %794 = vmatpush3.bf16.msra.mxu0 %v905_v59  ;;  %845 = vmatpush3.bf16.msra.mxu1 %v906_v60 }
  0x60   :  { %846 = vmatprep.subr.bf16.mxu1 %v1006_v0  ;;  %795 = vmatprep.subr.bf16.mxu0 %v907_v61 }
  0x63   :  { %796 = vmatpush3.bf16.msra.mxu0 %v908_v62  ;;  %847 = vmatpush3.bf16.msra.mxu1 %v909_v63 }
  0x64   :  { %848 = vmatprep.subr.bf16.mxu1 %v1006_v0  ;;  %797 = vmatprep.subr.bf16.mxu0 %v910_v1 }
  0x67   :  { %798 = vmatpush3.bf16.msra.mxu0 %v911_v2  ;;  %849 = vmatpush3.bf16.msra.mxu1 %v912_v3 }
 0x10a   :  { %v768_v4 = vpop.f32.mrf.mxu0  ;;  %v363_v5 = vpop.f32.mrf.mxu1 }
 0x10c   :  { %v769_v7 = vpop.f32.mrf.mxu0  ;;  %v832_v9 = vpop.f32.mrf.mxu1 }
 0x10d   :  { %v770_v8 = vadd.f32 %v769_v7, %v768_v4 }
 0x10e   :  { %v771_v10 = vpop.f32.mrf.mxu0  ;;  %v366_v12 = vpop.f32.mrf.mxu1 }
 0x10f   :  { %v323_v11 = vadd.f32 %v770_v8, %v690_v6 }
 0x110   :  { %v772_v13 = vpop.f32.mrf.mxu0  ;;  %v833_v15 = vpop.f32.mrf.mxu1 }
 0x111   :  { %v364_v14 = vadd.f32 %v363_v5, %v323_v11  ;;  %v773_v0 = vadd.f32 %v772_v13, %v771_v10 }
 0x113   :  { %v326_v16 = vadd.f32 %v773_v0, %v690_v6  ;;  %v370_v17 = vmax.f32 %v364_v14, 0.0 }
 0x115   :  { %v367_v18 = vadd.f32 %v366_v12, %v326_v16  ;;  %v372_v21 = vrot.slane %v370_v17, 7  ;;  %v378_v22 = vrot.slane %v370_v17, 1 }
 0x117   :  { %v371_v20 = vmax.f32 %v367_v18, 0.0 }
 0x119   :  { %v373_v23 = vrot.slane %v371_v20, 7  ;;  %v379_v24 = vrot.slane %v371_v20, 1  ;;  %v385_v25 = vpack.c.bf16 %v371_v20, %v370_v17 }
 0x11b   :  { %618 = vmatprep.mubr.bf16.mxu0 %v385_v25  ;;  %v374_v28 = vsel %vm74_vm2, %v372_v21, %v373_v23  ;;  %v375_v29 = vsel %vm74_vm2, %v373_v23, %v372_v21  ;;  %v380_v30 = vsel %vm81_vm3, %v378_v22, %v379_v24  ;;  %v381_v31 = vsel %vm81_vm3, %v379_v24, %v378_v22 }
 0x11c   :  { %v747_v33 = vpack.c.bf16 %v374_v28, %v375_v29  ;;  %v750_v34 = vpack.c.bf16 %v381_v31, %v380_v30 }
 0x11e   :  { %748 = vmatmul.mubr.msk.bf16.vlgmr.msra.gmra.mxu0 %vm1078_vm5, %v747_v33  ;;  %851 = vmatmul.mubr.msk.bf16.vlgmr.msra.gmra.mxu1 %vm1094_vm7, %v750_v34 }
 0x1de   :  { %v799_v35 = vpop.f32.mrf.mxu0  ;;  %v661_v36 = vpop.f32.mrf.mxu1 }
 0x1e0   :  { %v800_v38 = vpop.f32.mrf.mxu0  ;;  %v852_v39 = vpop.f32.mrf.mxu1 }
 0x1e1   :  { %v801_v40 = vadd.f32 %v800_v38, %v799_v35 }
 0x1e2   :  { %v802_v42 = vpop.f32.mrf.mxu0  ;;  %v664_v19 = vpop.f32.mrf.mxu1 }
 0x1e3   :  { %v621_v43 = vadd.f32 %v801_v40, %v721_v37 }
 0x1e4   :  { %v803_v44 = vpop.f32.mrf.mxu0  ;;  %v853_v45 = vpop.f32.mrf.mxu1 }
 0x1e5   :  { %v662_v46 = vadd.f32 %v661_v36, %v621_v43  ;;  %v804_v32 = vadd.f32 %v803_v44, %v802_v42 }
 0x1e7   :  { %v624_v47 = vadd.f32 %v804_v32, %v721_v37  ;;  %v668_v41 = vadd.f32 %v662_v46, %v1064_v26 }
 0x1e9   :  { %v665_v48 = vadd.f32 %v664_v19, %v624_v47  ;;  %670 = vst [vmem:[#allocation8] sm:$0xff] %v668_v41 }
 0x1eb   :  { %v669_v49 = vadd.f32 %v665_v48, %v1066_v27 }
 0x1ed   :  { %671 = vst [vmem:[#allocation8 + $0x8] sm:$0xff] %v669_v49 }
 0x1ee   :  { %984 = shalt.err (!%p981_p5)
}
 0x1ef   :  { %683 = dma.vmem_to_hbm [thread:$0]  %s678_s13, 256, %s1143_s5, [#allocation4], %s1003_s28, %s1003_s28, %s1004_s29  }
 0x1f0   :  { %997 = dma.done.wait [#allocation4], 256  }
 0x1f1   :  { %998 = vsyncadd [#allocation4], 4294967040 }
 0x1f2   :  { %687 = vsyncpa [#allocation3], 1 }
 0x1f3   :  { %688 = vsyncpa [#allocation6], 1 }
 0x1f4   :  { %689 = vsyncpa [#allocation4], 1 }

</bundles_post_ra>
